<compile_context>
chip_gen: v7x
topology: tpu7x:2x2x1
jax: 0.10.0
libtpu: 0.0.40
codegen_flags: <defaults>
</compile_context>

<pallas_src>
import functools

import jax
import jax.numpy as jnp
from jax.experimental import pallas as pl
from jax.experimental.pallas import tpu as pltpu


def _inverted_residual_kernel(nb, Cb, W, HW,
                              x_ref, w_ref, comb_ref, bias_ref, out_ref):
  """Processes `nb` images per grid step.

  x_ref    : (nb, 2*Cb, HW)   input, channels x flattened spatial
  w_ref    : (2, Cb, Cb)      [0] = 1x1 conv #1 (out,in), BN1 scale folded
                              [1] = 1x1 conv #2 (out,in), BN3 scale folded
  comb_ref : (9, Cb, HW) f32  per-tap (depthwise weight * boundary mask),
                              BN2 scale folded; constant index_map -> resident
  bias_ref : (2, Cb, 1) f32   [0] = BN1 shift
                              [1] = BN3 shift with BN2 shift folded through w2
  out_ref  : (nb, Cb, 2*HW)   lanes [0,HW)  = passthrough half (even channels)
                              lanes [HW,..) = branch2 output  (odd channels)
  """
  f32 = jnp.float32
  w1 = w_ref[0]
  w2 = w_ref[1]
  b1 = bias_ref[0]
  b3 = bias_ref[1]

  for b in range(nb):                       # nb is small & static -> unrolled
    # --- branch2: 1x1 conv -> +shift -> ReLU (f32 accumulation) -------------
    x2 = x_ref[b, Cb:, :]                   # static sublane slice (no pad-K)
    t = jnp.dot(w1, x2, preferred_element_type=f32)            # (Cb, HW)
    t = jnp.maximum(t + b1, 0.0)

    # --- branch2: 3x3 depthwise (stride 1, pad 1), strictly f32 -------------
    # Spatial shift == lane rotation of the row-major flattened spatial dim;
    # zero padding is baked into the precomputed comb tiles.
    acc = t * comb_ref[4]                   # center tap
    for dy in (-1, 0, 1):
      for dx in (-1, 0, 1):
        if dy == 0 and dx == 0:
          continue
        k = (dy + 1) * 3 + (dx + 1)
        shift = (-(dy * W + dx)) % HW       # shifted[p] = t[p + dy*W + dx]
        acc = acc + pltpu.roll(t, shift=shift, axis=1) * comb_ref[k]

    # --- branch2: 1x1 conv -> +shift -> ReLU --------------------------------
    y = jnp.dot(w2, acc.astype(w2.dtype), preferred_element_type=f32) + b3
    y = jnp.maximum(y, 0.0)

    # --- fused concat + channel_shuffle via the output layout ---------------
    out_ref[b, :, 0:HW] = x_ref[b, :Cb, :]               # -> even channels
    out_ref[b, :, HW:2 * HW] = y.astype(out_ref.dtype)   # -> odd channels


def inverted_residual_stride1(x_nchw, params, *, nb=1,
                              compute_dtype=jnp.float32):
  """Pallas implementation of InvertedResidual.forward for stride=1."""
  w1, dw, w2, s1, b1, s2, b2, s3, b3 = params
  N, C, H, W = x_nchw.shape
  Cb = C // 2
  HW = H * W
  f32 = jnp.float32
  assert C == 2 * Cb
  assert N % nb == 0, "batch must be divisible by the per-step batch block"
  assert HW % 128 == 0, "flattened spatial dim must be a multiple of 128"

  # ---- one-time host-side parameter folding (tiny constants) ---------------
  w1_oi = w1.T * s1[0][:, None]              # (Cb,Cb) out,in; BN1 scale folded
  w2_oi = w2.T * s3[0][:, None]              # (Cb,Cb) out,in; BN3 scale folded
  dw_f = dw.T * s2[0][:, None]               # (Cb, 9);        BN2 scale folded
  b1c = b1[0]                                # (Cb,)
  b3c = w2_oi @ b2[0] + b3[0]                # BN2 shift folded through conv #2
  bias_pack = jnp.stack([b1c, b3c]).astype(f32)[:, :, None]       # (2, Cb, 1)
  w_pack = jnp.stack([w1_oi, w2_oi]).astype(compute_dtype)        # (2, Cb, Cb)

  # Per-tap combined (depthwise weight x zero-pad boundary mask) tiles.
  # Host-side arange/% handles any W (power-of-two not required).
  pos = jnp.arange(HW)
  row, col = pos // W, pos % W
  combs = []
  for dy in (-1, 0, 1):
    for dx in (-1, 0, 1):
      valid = ((row + dy >= 0) & (row + dy < H) &
               (col + dx >= 0) & (col + dx < W)).astype(f32)      # (HW,)
      k = (dy + 1) * 3 + (dx + 1)
      combs.append(dw_f[:, k][:, None] * valid[None, :])          # (Cb, HW)
  comb = jnp.stack(combs).astype(f32)                             # (9, Cb, HW)

  # NCHW -> (N, C, HW) is a free reshape (channels stay on the sublane axis).
  # In production the activations would already live in HBM as compute_dtype.
  x_flat = x_nchw.reshape(N, C, HW).astype(compute_dtype)

  kernel = functools.partial(_inverted_residual_kernel, nb, Cb, W, HW)
  out = pl.pallas_call(
      kernel,
      out_shape=jax.ShapeDtypeStruct((N, Cb, 2 * HW), compute_dtype),
      grid_spec=pltpu.PrefetchScalarGridSpec(
          num_scalar_prefetch=0,
          grid=(N // nb,),
          in_specs=[
              pl.BlockSpec((nb, C, HW), lambda n: (n, 0, 0)),   # x
              pl.BlockSpec((2, Cb, Cb), lambda n: (0, 0, 0)),   # packed 1x1 w
              pl.BlockSpec((9, Cb, HW), lambda n: (0, 0, 0)),   # dw comb tiles
              pl.BlockSpec((2, Cb, 1), lambda n: (0, 0, 0)),    # packed shifts
          ],
          out_specs=pl.BlockSpec((nb, Cb, 2 * HW), lambda n: (n, 0, 0)),
      ),
      # Batch steps are independent -> sharded across TensorCores on v7x.
      # Explicit VMEM limit instead of the 16/32 MiB scoped default.
      compiler_params=pltpu.CompilerParams(
          dimension_semantics=("parallel",),
          vmem_limit_bytes=32 * 1024 * 1024,
      ),
  )(x_flat, w_pack, comb, bias_pack)

  # (N, Cb, 2*HW) -> (N, C, H, W) is a free reshape AND performs the
  # channel_shuffle: output channel 2j = x1[j], channel 2j+1 = branch2[j].
  return out.reshape(N, C, H, W)


def _reference(x_nchw, params):
  """Pure-JAX reference with identical semantics (for verification)."""
  w1, dw, w2, s1, b1, s2, b2, s3, b3 = params
  N, C, H, W = x_nchw.shape
  Cb = C // 2
  x = jnp.transpose(x_nchw, (0, 2, 3, 1)).astype(jnp.float32)
  x1, x2 = x[..., :Cb], x[..., Cb:]
  t = jnp.maximum(jnp.einsum("nhwc,cd->nhwd", x2, w1) * s1[0] + b1[0], 0.0)
  tp = jnp.pad(t, ((0, 0), (1, 1), (1, 1), (0, 0)))
  acc = jnp.zeros_like(t)
  for dy in range(3):
    for dx in range(3):
      acc = acc + tp[:, dy:dy + H, dx:dx + W, :] * dw[dy * 3 + dx]
  acc = acc * s2[0] + b2[0]
  y = jnp.maximum(jnp.einsum("nhwc,cd->nhwd", acc, w2) * s3[0] + b3[0], 0.0)
  out = jnp.concatenate([x1, y], axis=-1)
  out = out.reshape(N, H, W, 2, Cb).transpose(0, 1, 2, 4, 3).reshape(N, H, W, C)
  return jnp.transpose(out, (0, 3, 1, 2))


def _make_params(key, Cb, eps=1e-5):
  ks = jax.random.split(key, 16)
  # 1x1 conv weights stored as (in, out) matrices; depthwise as (9, Cb) taps.
  w1 = 0.1 * jax.random.normal(ks[0], (Cb, Cb), jnp.float32)
  dw = 0.1 * jax.random.normal(ks[1], (9, Cb), jnp.float32)
  w2 = 0.1 * jax.random.normal(ks[2], (Cb, Cb), jnp.float32)

  def bn(kg, kb, km, kv):
    gamma = jax.random.uniform(kg, (1, Cb), jnp.float32, 0.5, 1.5)
    beta = 0.1 * jax.random.normal(kb, (1, Cb), jnp.float32)
    mean = 0.1 * jax.random.normal(km, (1, Cb), jnp.float32)
    var = jax.random.uniform(kv, (1, Cb), jnp.float32, 0.5, 1.5)
    scale = gamma / jnp.sqrt(var + eps)
    shift = beta - mean * scale
    return scale, shift

  s1, b1 = bn(ks[3], ks[4], ks[5], ks[6])
  s2, b2 = bn(ks[7], ks[8], ks[9], ks[10])
  s3, b3 = bn(ks[11], ks[12], ks[13], ks[14])
  return (w1, dw, w2, s1, b1, s2, b2, s3, b3)


if __name__ == "__main__":
  key = jax.random.PRNGKey(0)
  kx, kp, kx2, kp2 = jax.random.split(key, 4)

  # InvertedResidual(inp=16, oup=16, stride=1): branch_features = 8 = inp // 2.
  N, C, H, W = 2, 16, 16, 16
  x = jax.random.normal(kx, (N, C, H, W), jnp.float32)
  params = _make_params(kp, C // 2)

  out = jax.block_until_ready(inverted_residual_stride1(x, params, nb=1))
  ref = jax.block_until_ready(_reference(x, params))
  assert out.shape == (N, C, H, W)
  assert jnp.max(jnp.abs(out - ref)) < 1e-3, "f32 mismatch vs reference"

  # Second config: bf16 MXU operands (f32 accumulation, f32 depthwise path),
  # nb=2 images per grid step, non-power-of-two width (W=24 -> HW=384).
  N2, C2, H2, W2 = 2, 16, 16, 24
  x2 = jax.random.normal(kx2, (N2, C2, H2, W2), jnp.float32)
  params2 = _make_params(kp2, C2 // 2)
  out2 = jax.block_until_ready(
      inverted_residual_stride1(x2, params2, nb=2,
                                compute_dtype=jnp.bfloat16))
  x2_q = x2.astype(jnp.bfloat16).astype(jnp.float32)
  ref2 = jax.block_until_ready(_reference(x2_q, params2))
  assert out2.shape == (N2, C2, H2, W2)
  # Loose numeric tolerance: bf16-rounded activations/weights vs f32 reference.
  assert jnp.max(jnp.abs(out2.astype(jnp.float32) - ref2)) < 1e-1, \
      "bf16 mismatch vs reference"

  print("KERNEL_OK")
</pallas_src>

<mosaic_0001>
module attributes {stable_mosaic.version = 11 : i64} {
  func.func @_inverted_residual_kernel(%arg0: i32, %arg1: memref<1x16x256xf32, #tpu.memory_space<vmem>>, %arg2: memref<2x8x8xf32, #tpu.memory_space<vmem>>, %arg3: memref<9x8x256xf32, #tpu.memory_space<vmem>>, %arg4: memref<2x8x1xf32, #tpu.memory_space<vmem>>, %arg5: memref<1x8x512xf32, #tpu.memory_space<vmem>>) attributes {dimension_semantics = [#tpu.dimension_semantics<parallel>], iteration_bounds = array<i64: 2>, scalar_prefetch = 0 : i64, scratch_operands = 0 : i64, tpu.core_type = #tpu.core_type<tc>, window_params = [{transform_indices = @transform_0, window_bounds = array<i64: 1, 16, 256>}, {pipeline_mode = #tpu.pipeline_mode<synchronous>, transform_indices = @transform_1, window_bounds = array<i64: 2, 8, 8>}, {pipeline_mode = #tpu.pipeline_mode<synchronous>, transform_indices = @transform_2, window_bounds = array<i64: 9, 8, 256>}, {pipeline_mode = #tpu.pipeline_mode<synchronous>, transform_indices = @transform_3, window_bounds = array<i64: 2, 8, 1>}, {transform_indices = @transform_4, window_bounds = array<i64: 1, 8, 512>}]} {
    %c0 = arith.constant 0 : index
    %c0_0 = arith.constant 0 : index
    %c0_1 = arith.constant 0 : index
    %0 = vector.load %arg2[%c0, %c0_0, %c0_1] : memref<2x8x8xf32, #tpu.memory_space<vmem>>, vector<1x8x8xf32>
    %1 = vector.shape_cast %0 : vector<1x8x8xf32> to vector<8x8xf32>
    %c1 = arith.constant 1 : index
    %c0_2 = arith.constant 0 : index
    %c0_3 = arith.constant 0 : index
    %2 = vector.load %arg2[%c1, %c0_2, %c0_3] : memref<2x8x8xf32, #tpu.memory_space<vmem>>, vector<1x8x8xf32>
    %3 = vector.shape_cast %2 : vector<1x8x8xf32> to vector<8x8xf32>
    %c0_4 = arith.constant 0 : index
    %c0_5 = arith.constant 0 : index
    %c0_6 = arith.constant 0 : index
    %4 = vector.load %arg4[%c0_4, %c0_5, %c0_6] : memref<2x8x1xf32, #tpu.memory_space<vmem>>, vector<1x8x1xf32>
    %5 = vector.shape_cast %4 : vector<1x8x1xf32> to vector<8x1xf32>
    %c1_7 = arith.constant 1 : index
    %c0_8 = arith.constant 0 : index
    %c0_9 = arith.constant 0 : index
    %6 = vector.load %arg4[%c1_7, %c0_8, %c0_9] : memref<2x8x1xf32, #tpu.memory_space<vmem>>, vector<1x8x1xf32>
    %7 = vector.shape_cast %6 : vector<1x8x1xf32> to vector<8x1xf32>
    %c0_10 = arith.constant 0 : index
    %c8 = arith.constant 8 : index
    %c0_11 = arith.constant 0 : index
    %8 = vector.load %arg1[%c0_10, %c8, %c0_11] : memref<1x16x256xf32, #tpu.memory_space<vmem>>, vector<1x8x256xf32>
    %9 = vector.shape_cast %8 : vector<1x8x256xf32> to vector<8x256xf32>
    %cst = arith.constant dense<0.000000e+00> : vector<8x256xf32>
    %10 = tpu.matmul %1, %9, %cst {dimension_numbers = #tpu.dot_dimension_numbers<[1], [0], [0], [1], [0, 0, 1, 1], [], []>} : vector<8x8xf32>, vector<8x256xf32>, vector<8x256xf32> -> vector<8x256xf32>
    %11 = vector.broadcast %5 : vector<8x1xf32> to vector<8x256xf32>
    %12 = arith.addf %10, %11 : vector<8x256xf32>
    %cst_12 = arith.constant 0.000000e+00 : f32
    %13 = vector.broadcast %cst_12 : f32 to vector<8x256xf32>
    %14 = arith.maximumf %12, %13 : vector<8x256xf32>
    %c4 = arith.constant 4 : index
    %c0_13 = arith.constant 0 : index
    %c0_14 = arith.constant 0 : index
    %15 = vector.load %arg3[%c4, %c0_13, %c0_14] : memref<9x8x256xf32, #tpu.memory_space<vmem>>, vector<1x8x256xf32>
    %16 = vector.shape_cast %15 : vector<1x8x256xf32> to vector<8x256xf32>
    %17 = arith.mulf %14, %16 : vector<8x256xf32>
    %c17_i32 = arith.constant 17 : i32
    %18 = tpu.dynamic_rotate %14 by %c17_i32 dim 1 : vector<8x256xf32>, i32 -> vector<8x256xf32>
    %c0_15 = arith.constant 0 : index
    %c0_16 = arith.constant 0 : index
    %c0_17 = arith.constant 0 : index
    %19 = vector.load %arg3[%c0_15, %c0_16, %c0_17] : memref<9x8x256xf32, #tpu.memory_space<vmem>>, vector<1x8x256xf32>
    %20 = vector.shape_cast %19 : vector<1x8x256xf32> to vector<8x256xf32>
    %21 = arith.mulf %18, %20 : vector<8x256xf32>
    %22 = arith.addf %17, %21 : vector<8x256xf32>
    %c16_i32 = arith.constant 16 : i32
    %23 = tpu.dynamic_rotate %14 by %c16_i32 dim 1 : vector<8x256xf32>, i32 -> vector<8x256xf32>
    %c1_18 = arith.constant 1 : index
    %c0_19 = arith.constant 0 : index
    %c0_20 = arith.constant 0 : index
    %24 = vector.load %arg3[%c1_18, %c0_19, %c0_20] : memref<9x8x256xf32, #tpu.memory_space<vmem>>, vector<1x8x256xf32>
    %25 = vector.shape_cast %24 : vector<1x8x256xf32> to vector<8x256xf32>
    %26 = arith.mulf %23, %25 : vector<8x256xf32>
    %27 = arith.addf %22, %26 : vector<8x256xf32>
    %c15_i32 = arith.constant 15 : i32
    %28 = tpu.dynamic_rotate %14 by %c15_i32 dim 1 : vector<8x256xf32>, i32 -> vector<8x256xf32>
    %c2 = arith.constant 2 : index
    %c0_21 = arith.constant 0 : index
    %c0_22 = arith.constant 0 : index
    %29 = vector.load %arg3[%c2, %c0_21, %c0_22] : memref<9x8x256xf32, #tpu.memory_space<vmem>>, vector<1x8x256xf32>
    %30 = vector.shape_cast %29 : vector<1x8x256xf32> to vector<8x256xf32>
    %31 = arith.mulf %28, %30 : vector<8x256xf32>
    %32 = arith.addf %27, %31 : vector<8x256xf32>
    %c1_i32 = arith.constant 1 : i32
    %33 = tpu.dynamic_rotate %14 by %c1_i32 dim 1 : vector<8x256xf32>, i32 -> vector<8x256xf32>
    %c3 = arith.constant 3 : index
    %c0_23 = arith.constant 0 : index
    %c0_24 = arith.constant 0 : index
    %34 = vector.load %arg3[%c3, %c0_23, %c0_24] : memref<9x8x256xf32, #tpu.memory_space<vmem>>, vector<1x8x256xf32>
    %35 = vector.shape_cast %34 : vector<1x8x256xf32> to vector<8x256xf32>
    %36 = arith.mulf %33, %35 : vector<8x256xf32>
    %37 = arith.addf %32, %36 : vector<8x256xf32>
    %c255_i32 = arith.constant 255 : i32
    %38 = tpu.dynamic_rotate %14 by %c255_i32 dim 1 : vector<8x256xf32>, i32 -> vector<8x256xf32>
    %c5 = arith.constant 5 : index
    %c0_25 = arith.constant 0 : index
    %c0_26 = arith.constant 0 : index
    %39 = vector.load %arg3[%c5, %c0_25, %c0_26] : memref<9x8x256xf32, #tpu.memory_space<vmem>>, vector<1x8x256xf32>
    %40 = vector.shape_cast %39 : vector<1x8x256xf32> to vector<8x256xf32>
    %41 = arith.mulf %38, %40 : vector<8x256xf32>
    %42 = arith.addf %37, %41 : vector<8x256xf32>
    %c241_i32 = arith.constant 241 : i32
    %43 = tpu.dynamic_rotate %14 by %c241_i32 dim 1 : vector<8x256xf32>, i32 -> vector<8x256xf32>
    %c6 = arith.constant 6 : index
    %c0_27 = arith.constant 0 : index
    %c0_28 = arith.constant 0 : index
    %44 = vector.load %arg3[%c6, %c0_27, %c0_28] : memref<9x8x256xf32, #tpu.memory_space<vmem>>, vector<1x8x256xf32>
    %45 = vector.shape_cast %44 : vector<1x8x256xf32> to vector<8x256xf32>
    %46 = arith.mulf %43, %45 : vector<8x256xf32>
    %47 = arith.addf %42, %46 : vector<8x256xf32>
    %c240_i32 = arith.constant 240 : i32
    %48 = tpu.dynamic_rotate %14 by %c240_i32 dim 1 : vector<8x256xf32>, i32 -> vector<8x256xf32>
    %c7 = arith.constant 7 : index
    %c0_29 = arith.constant 0 : index
    %c0_30 = arith.constant 0 : index
    %49 = vector.load %arg3[%c7, %c0_29, %c0_30] : memref<9x8x256xf32, #tpu.memory_space<vmem>>, vector<1x8x256xf32>
    %50 = vector.shape_cast %49 : vector<1x8x256xf32> to vector<8x256xf32>
    %51 = arith.mulf %48, %50 : vector<8x256xf32>
    %52 = arith.addf %47, %51 : vector<8x256xf32>
    %c239_i32 = arith.constant 239 : i32
    %53 = tpu.dynamic_rotate %14 by %c239_i32 dim 1 : vector<8x256xf32>, i32 -> vector<8x256xf32>
    %c8_31 = arith.constant 8 : index
    %c0_32 = arith.constant 0 : index
    %c0_33 = arith.constant 0 : index
    %54 = vector.load %arg3[%c8_31, %c0_32, %c0_33] : memref<9x8x256xf32, #tpu.memory_space<vmem>>, vector<1x8x256xf32>
    %55 = vector.shape_cast %54 : vector<1x8x256xf32> to vector<8x256xf32>
    %56 = arith.mulf %53, %55 : vector<8x256xf32>
    %57 = arith.addf %52, %56 : vector<8x256xf32>
    %cst_34 = arith.constant dense<0.000000e+00> : vector<8x256xf32>
    %58 = tpu.matmul %3, %57, %cst_34 {dimension_numbers = #tpu.dot_dimension_numbers<[1], [0], [0], [1], [0, 0, 1, 1], [], []>} : vector<8x8xf32>, vector<8x256xf32>, vector<8x256xf32> -> vector<8x256xf32>
    %59 = vector.broadcast %7 : vector<8x1xf32> to vector<8x256xf32>
    %60 = arith.addf %58, %59 : vector<8x256xf32>
    %cst_35 = arith.constant 0.000000e+00 : f32
    %61 = vector.broadcast %cst_35 : f32 to vector<8x256xf32>
    %62 = arith.maximumf %60, %61 : vector<8x256xf32>
    %c0_36 = arith.constant 0 : index
    %c0_37 = arith.constant 0 : index
    %c0_38 = arith.constant 0 : index
    %63 = vector.load %arg1[%c0_36, %c0_37, %c0_38] : memref<1x16x256xf32, #tpu.memory_space<vmem>>, vector<1x8x256xf32>
    %64 = vector.shape_cast %63 : vector<1x8x256xf32> to vector<8x256xf32>
    %c0_39 = arith.constant 0 : index
    %c0_40 = arith.constant 0 : index
    %c0_41 = arith.constant 0 : index
    %65 = vector.load %arg5[%c0_39, %c0_40, %c0_41] : memref<1x8x512xf32, #tpu.memory_space<vmem>>, vector<1x8x256xf32>
    %66 = vector.shape_cast %65 : vector<1x8x256xf32> to vector<8x256xf32>
    %67 = vector.shape_cast %64 : vector<8x256xf32> to vector<1x8x256xf32>
    tpu.vector_store %arg5[%c0_39, %c0_40, %c0_41], %67 {strides = array<i32>} : memref<1x8x512xf32, #tpu.memory_space<vmem>>, vector<1x8x256xf32>,
    %c0_42 = arith.constant 0 : index
    %c0_43 = arith.constant 0 : index
    %c256 = arith.constant 256 : index
    %68 = vector.load %arg5[%c0_42, %c0_43, %c256] : memref<1x8x512xf32, #tpu.memory_space<vmem>>, vector<1x8x256xf32>
    %69 = vector.shape_cast %68 : vector<1x8x256xf32> to vector<8x256xf32>
    %70 = vector.shape_cast %62 : vector<8x256xf32> to vector<1x8x256xf32>
    tpu.vector_store %arg5[%c0_42, %c0_43, %c256], %70 {strides = array<i32>} : memref<1x8x512xf32, #tpu.memory_space<vmem>>, vector<1x8x256xf32>,
    return
  }
  func.func @transform_0(%arg0: i32) -> (i32, i32, i32) {
    %c0_i32 = arith.constant 0 : i32
    %c0_i32_0 = arith.constant 0 : i32
    %c0_i32_1 = arith.constant 0 : i32
    return %arg0, %c0_i32, %c0_i32_0 : i32, i32, i32
  }
  func.func @transform_1(%arg0: i32) -> (i32, i32, i32) {
    %c0_i32 = arith.constant 0 : i32
    %c0_i32_0 = arith.constant 0 : i32
    %c0_i32_1 = arith.constant 0 : i32
    %c0_i32_2 = arith.constant 0 : i32
    return %c0_i32, %c0_i32_0, %c0_i32_1 : i32, i32, i32
  }
  func.func @transform_2(%arg0: i32) -> (i32, i32, i32) {
    %c0_i32 = arith.constant 0 : i32
    %c0_i32_0 = arith.constant 0 : i32
    %c0_i32_1 = arith.constant 0 : i32
    %c0_i32_2 = arith.constant 0 : i32
    return %c0_i32, %c0_i32_0, %c0_i32_1 : i32, i32, i32
  }
  func.func @transform_3(%arg0: i32) -> (i32, i32, i32) {
    %c0_i32 = arith.constant 0 : i32
    %c0_i32_0 = arith.constant 0 : i32
    %c0_i32_1 = arith.constant 0 : i32
    %c0_i32_2 = arith.constant 0 : i32
    return %c0_i32, %c0_i32_0, %c0_i32_1 : i32, i32, i32
  }
  func.func @transform_4(%arg0: i32) -> (i32, i32, i32) {
    %c0_i32 = arith.constant 0 : i32
    %c0_i32_0 = arith.constant 0 : i32
    %c0_i32_1 = arith.constant 0 : i32
    return %arg0, %c0_i32, %c0_i32_0 : i32, i32, i32
  }
}

</mosaic_0001>

<bundles_post_ra>
// kernel: tpu_custom_call.1
= control target key start
LH: loop header
LB: loop body
LE: loop exit
PB: predicated region body
PF: predicated region fallthrough
CT: control target
= control target key end

     0   :  { %9 = vsyncpa [#allocation3], 0  ;;  %s1139_s0 = inlined_call_operand.hbm [shape: f32[2,16,256], index: 0, kind: input, shape index: {}]   ;;  %s1140_s1 = inlined_call_operand.vmem [shape: f32[2,8,8], index: 1, kind: input, shape index: {}]   ;;  %s1141_s2 = inlined_call_operand.hbm [shape: f32[9,8,256], index: 2, kind: input, shape index: {}]   ;;  %s1142_s3 = inlined_call_operand.vmem [shape: f32[2,8,1], index: 3, kind: input, shape index: {}]   ;;  %s1143_s4 = inlined_call_operand.hbm [shape: f32[2,8,512], index: 4, kind: output, shape index: {}]  }
   0x1   :  { %11 = vsyncpa [#allocation3 + $0x1], 0 }
   0x2   :  { %12 = vsyncpa [#allocation6], 0 }
   0x3   :  { %13 = vsyncpa [#allocation4], 0 }
   0x4   :  { %15 = vsyncpa [#allocation4 + $0x1], 0  ;;  %s884_s15 = smov 0   ;;  %s886_s16 = smov 0  }
   0x5   :  { %s888_s17 = smov 0   ;;  %s890_s18 = smov 0  }
   0x6 LB: > { %s905_s19 = sadd.s32 4294967295, %s842_s18   ;;  %s621_s20 = sadd.s32 4294967294, %s842_s18   ;;  %s842_s18 = sphi %s890_s18, %s1163_s18   ;;  %s838_s17 = sphi %s888_s17, %s1162_s17   ;;  %s834_s16 = sphi %s886_s16, %s1161_s16   ;;  %s830_s15 = sphi %s884_s15, %s1160_s15  }
   0x7   : > { %p41_p0 = scmp.ne.s32.totalorder %s834_s16, %s830_s15  ;;  %p1144_p1 = scmp.eq.s32.totalorder %s905_s19, 0 }
   0x8   : > { %p134_p3 = scmp.eq.s32.totalorder %s621_s20, 1  ;;  %p622_p5 = scmp.ge.s32.totalorder %s842_s18, 1 }
   0x9   : > { %p914_p4 = por %p1144_p1, %p41_p0  ;;  %p141_p7 = scmp.lt.s32.totalorder %s842_s18, 3 }
   0xa   : > { %p919_p6 = por %p134_p3, %p41_p0  ;;  %s844_s24 = smov [#allocation5]  }
   0xb   : > { %s1147_s21 = scalar_select %p914_p4, 1, 0 }
   0xc   : > { %s1148_s22 = scalar_select %p919_p6, 1, 0 }
   0xd   : > { %p924_p8 = pnand %p622_p5, %p141_p7  ;;  %s156_s25 = sshll.u32 %s844_s24, 4  ;;  %s928_s25 = int_to_ptr.vmem [resolvable:$true] %s156_s25 }
   0xe   : > { %s940_s27 = sadd.s32 1, %s842_s18   ;;  %s28_s28 = sadd.s32 1, %s838_s17 }
   0xf   : > { %s1149_s23 = scalar_select %p924_p8, 1, 0 }
  0x10   : > { %p651_p9 = pneg %p924_p8  ;;  %s25_s29 = ssub.s32 %s842_s18, %s940_s27 }
  0x11   : > { %s714_s6 = scalar_lea.hbm %s1141_s2, 2304 }
  0x12   : > { %p935_p11 = pnand %p651_p9, %p1144_p1  ;;  %p715_p12 = scmp.ne.s32.totalorder %s1141_s2, %s714_s6 }
  0x13   : > { %p721_p5 = scmp.lt.u32.totalorder %s714_s6, %s1141_s2 }
  0x14   : > { %p716_p13 = pneg %p935_p11 }
  0x16   : > { %p717_p0 = pnand %p716_p13, %p715_p12 }
  0x18   : > { %p718_p3 = pneg %p717_p0 }
  0x1a   : > { %p723_p7 = pnand %p721_p5, %p718_p3 }
  0x1c   : > { %726 = shalt.err (!%p723_p7)
}
  0x1d   : > { %s727_s11 = scalar_lea.vmem %s928_s25, 2304  ;;  %p735_p2 = scmp.lt.s32.totalorder %s928_s25, %s928_s25 }
  0x1e   : > { %p728_p9 = scmp.ne.s32.totalorder %s928_s25, %s727_s11  ;;  %p736_p6 = scmp.lt.s32.totalorder %s727_s11, %s727_s11 }
  0x20   : > { %p730_p10 = pnand %p728_p9, %p716_p13  ;;  %p737_p4 = por %p736_p6, %p735_p2 }
  0x22   : > { %p731_p1 = pneg %p730_p10 }
  0x24   : > { %p738_p8 = pnand %p737_p4, %p731_p1 }
  0x26   : > { %741 = shalt.err (!%p738_p8)
}
  0x27   : > { %s845_s12 = smov 256   ;;  %s846_s13 = smov 16  }
  0x28   : > { %654 = dma.hbm_to_vmem [thread:$0]  (!%p935_p11), %s1141_s2, 2304, %s928_s25, [#allocation6], %s845_s12, %s845_s12, %s846_s13  }
  0x29   : > { %p26_p1 = scmp.eq.s32.totalorder %s25_s29, 0  ;;  %p35_p2 = scmp.ne.s32.totalorder %s838_s17, %s834_s16 }
  0x2a   : > { %p36_p4 = scmp.eq.s32.totalorder %s842_s18, 0  ;;  %p664_p6 = scmp.lt.s32.totalorder %s842_s18, 2 }
  0x2b   : > { %s974_s24 = scalar_select %p26_p1, %s838_s17, %s28_s28  }
  0x2c   : > { %p37_p8 = por %p36_p4, %p35_p2  ;;  %p1151_p10 = scmp.eq.s32.totalorder %s905_s19, 1 }
  0x2d   : > { %s173_s26 = sand.u32 1, %s838_s17   ;;  %s641_s5 = sshll.u32 %s842_s18, 9 }
  0x2e   : > { %p978_p12 = por %p1151_p10, %p35_p2  ;;  %s625_s6 = sshll.u32 %s173_s26, 5 }
  0x2f   : > { %s987_s9 = scalar_lea.hbm %s1139_s0, %s641_s5  ;;  %s177_s25 = scalar_lea.vmem [#allocation2], %s625_s6 }
  0x30   : > { %s184_s28 = sshll.u32 %s177_s25, 4  ;;  %p989_p11 = pnand %p664_p6, %p37_p8  ;;  %s993_s28 = int_to_ptr.vmem [resolvable:$true] %s184_s28 }
  0x31   : > { %s995_s10 = scalar_lea.sflag [#allocation3], %s173_s26  ;;  %s742_s11 = scalar_lea.hbm %s987_s9, 512 }
  0x32   : > { %p743_p13 = scmp.ne.s32.totalorder %s987_s9, %s742_s11  ;;  %p744_p0 = pneg %p989_p11 }
  0x33   : > { %s747_s5 = scalar_lea.hbm %s1139_s0, 1024  ;;  %p748_p7 = scmp.lt.u32.totalorder %s987_s9, %s1139_s0 }
  0x34   : > { %p745_p3 = pnand %p744_p0, %p743_p13  ;;  %p749_p9 = scmp.lt.u32.totalorder %s747_s5, %s742_s11 }
  0x35   : > { %p751_p2 = scmp.lt.u32.totalorder %s742_s11, %s987_s9 }
  0x36   : > { %p746_p5 = pneg %p745_p3  ;;  %p750_p1 = por %p749_p9, %p748_p7 }
  0x38   : > { %p752_p4 = por %p751_p2, %p750_p1 }
  0x3a   : > { %p753_p6 = pnand %p752_p4, %p746_p5 }
  0x3c   : > { %756 = shalt.err (!%p753_p6)
}
  0x3d   : > { %s757_s26 = scalar_lea.vmem %s993_s28, 512  ;;  %s847_s8 = smov [#allocation2]  }
  0x3e   : > { %p758_p8 = scmp.ne.s32.totalorder %s993_s28, %s757_s26  ;;  %s762_s25 = sshll.u32 %s847_s8, 4  ;;  %s763_s25 = int_to_ptr.vmem [resolvable:$false] %s762_s25 }
  0x3f   : > { %s764_s14 = scalar_lea.vmem %s763_s25, 1024  ;;  %p765_p3 = scmp.lt.s32.totalorder %s993_s28, %s763_s25 }
  0x40   : > { %p760_p10 = pnand %p758_p8, %p744_p0  ;;  %p766_p7 = scmp.lt.s32.totalorder %s764_s14, %s757_s26 }
  0x42   : > { %p761_p13 = pneg %p760_p10  ;;  %p767_p9 = por %p766_p7, %p765_p3 }
  0x44   : > { %p768_p1 = pnand %p767_p9, %p761_p13 }
  0x46   : > { %771 = shalt.err (!%p768_p1)
}
  0x47   : > { %658 = dma.hbm_to_vmem [thread:$0]  (!%p989_p11), %s987_s9, 512, %s993_s28, %s995_s10, %s845_s12, %s845_s12, %s846_s13  }
  0x48   : > { %p1154_p0 = scmp.ne.s32.totalorder %s1149_s23, 0 }
  0x49   : > { %s1029_s11 = sand.u32 (!%p1154_p0), 1, %s834_s16   ;;  %p1155_p5 = scmp.ne.s32.totalorder (!%p1154_p0), %s1147_s21, 0 }
  0x4a   : > { %196 = sbr.rel (%p1154_p0) target bundleno = 687 (0x2af), region = 36  ;;  %s629_s20 = sshll.u32 (!%p1154_p0), %s1029_s11, 5 }
  0x4b   : > { %s199_s5 = scalar_lea.sflag (!%p1154_p0), [#allocation3], %s1029_s11  ;;  %s1035_s29 = scalar_lea.vmem (!%p1154_p0), [#allocation2], %s629_s20 }
  0x51   : > { %817 = dma.done.wait (%p1155_p5), %s199_s5, 512  }
  0x52   : > { %819 = vsyncadd (%p1155_p5), %s199_s5, 4294966784  ;;  %p1156_p11 = scmp.eq.s32.totalorder %s905_s19, 0 }
  0x54   : > { %821 = dma.done.wait (%p1156_p11), [#allocation6], 2304   ;;  %p1157_p2 = pmov %p1156_p11 }
  0x55   : > { %v848_v0 = vmov 0.0   ;;  %v849_v1 = vmov 0   ;;  %v238_v2 = vld [vmem:[%s1035_s29 + $0x18] sm:$0xff]  ;;  %v237_v3 = vld [vmem:[%s1035_s29 + $0x10] sm:$0xff]  ;;  %v231_v4 = vld [vmem:[%s1140_s1] sm:$0xff]  ;;  %vm244_vm0 = vcmask 64512   ;;  %v330_v16 = vlaneseq }
  0x56   : > { %823 = vsyncadd (%p1157_p2), [#allocation6], 4294964992  ;;  %312 = vmatprep.mubr.f32.mxu0 %v848_v0  ;;  %712 = vset.pattern.permute.xlu0 %v849_v1  ;;  %v234_v5 = vld [vmem:[%s1142_s3] sm:$0xff]  ;;  %s850_s9 = smov 16   ;;  %s851_s28 = smov 17   ;;  %v633_v13 = vld [vmem:[%s1142_s3 + $0x8] sm:$0xff] }
  0x57   : > { %511 = vmatprep.mubr.f32.mxu1 %v848_v0  ;;  %713 = vset.pattern.permute.xlu1 %v849_v1  ;;  %s852_s10 = smov 15   ;;  %s853_s6 = smov 1   ;;  %v1057_v19 = vand.u32 127, %v330_v16  ;;  %v322_v22 = vld [vmem:[#allocation5 + $0x40] sm:$0xff]  ;;  %v323_v23 = vld [vmem:[#allocation5 + $0x48] sm:$0xff]  ;;  %v349_v28 = vld [vmem:[#allocation5 + $0x10] sm:$0xff] }
  0x58   : > { %248 = vmatprep.subr.mxu0 %v238_v2  ;;  %241 = vperm.xlu0 %712, %v234_v5   ;;  %s854_s7 = smov 127   ;;  %s855_s26 = smov 113   ;;  %v335_v24 = vld [vmem:[#allocation5] sm:$0xff]  ;;  %v336_v25 = vld [vmem:[#allocation5 + $0x8] sm:$0xff]  ;;  %v350_v29 = vld [vmem:[#allocation5 + $0x18] sm:$0xff] }
  0x59   : > { %249 = vmatpush1.msra.mxu0 %v237_v3  ;;  %s856_s8 = smov 112   ;;  %s857_s25 = smov 111   ;;  %vm345_vm1 = vcmp.lt.s32.totalorder %v1057_v19, 16  ;;  %vm332_vm2 = vcmp.lt.s32.totalorder %v1057_v19, 17  ;;  %vm359_vm3 = vcmp.lt.s32.totalorder %v1057_v19, 15  ;;  %vm373_vm4 = vcmp.lt.s32.totalorder %v1057_v19, 1 }
  0x5a   : > { %634 = vmatmul.mubr.msk.f32.vlgmr.msra.gmra.mrb[0].mxu0 %vm244_vm0, %v231_v4  ;;  %v363_v38 = vld [vmem:[#allocation5 + $0x20] sm:$0xff]  ;;  %v364_v39 = vld [vmem:[#allocation5 + $0x28] sm:$0xff]  ;;  %vm387_vm5 = vcmp.lt.s32.totalorder %v1057_v19, 127  ;;  %v377_v48 = vld [vmem:[#allocation5 + $0x30] sm:$0xff]  ;;  %vm401_vm6 = vcmp.lt.s32.totalorder %v1057_v19, 113  ;;  %vm415_vm7 = vcmp.lt.s32.totalorder %v1057_v19, 112 }
  0x5b   : > { %v378_v49 = vld [vmem:[#allocation5 + $0x38] sm:$0xff]  ;;  %v391_v56 = vld [vmem:[#allocation5 + $0x50] sm:$0xff]  ;;  %v405_v2 = vld [vmem:[#allocation5 + $0x60] sm:$0xff]  ;;  %vm429_vm8 = vcmp.lt.s32.totalorder %v1057_v19, 111  ;;  %s230_s21 = scalar_lea.vmem [#allocation7], %s629_s20  ;;  %s642_s13 = sshll.u32 %s905_s19, 9 }
  0x5c   : > { %v392_v57 = vld [vmem:[#allocation5 + $0x58] sm:$0xff]  ;;  %v406_v3 = vld [vmem:[#allocation5 + $0x68] sm:$0xff]  ;;  %s527_s20 = scalar_lea.sflag [#allocation4], %s1029_s11  ;;  %s858_s19 = smov [#allocation7]  }
  0xd7   : > { %v242_v6 = vpop.permute.xlu0 %241 }
 0x12d   : > { %v314_v7 = vpop.f32.mrb[0].mxu0 }
 0x12e   : > { %v315_v8 = vadd.f32 %v314_v7, %v242_v6  ;;  %v316_v9 = vpop.f32.mrb[1].mxu0 }
 0x12f   : > { %v317_v11 = vadd.f32 %v316_v9, %v242_v6 }
 0x130   : > { %v319_v10 = vmax.f32 %v315_v8, 0.0 }
 0x131   : > { %v320_v12 = vmax.f32 %v317_v11, 0.0  ;;  %v420_v11 = vld [vmem:[#allocation5 + $0x78] sm:$0xff] }
 0x132   : > { %341 = vrot.lane.b32.xlu1 %v319_v10, %s850_s9  ;;  %326 = vrot.lane.b32.xlu0 %v319_v10, %s851_s28  ;;  %v324_v35 = vmul.f32 %v322_v22, %v319_v10 }
 0x133   : > { %v325_v34 = vmul.f32 %v323_v23, %v320_v12 }
 0x136   : > { %355 = vrot.lane.b32.xlu1 %v319_v10, %s852_s10  ;;  %343 = vrot.lane.b32.xlu0 %v320_v12, %s850_s9  ;;  %s541_s9 = sshll.u32 %s230_s21, 4  ;;  %s1097_s9 = int_to_ptr.vmem [resolvable:$true] %s541_s9 }
 0x13a   : > { %369 = vrot.lane.b32.xlu1 %v319_v10, %s853_s6  ;;  %357 = vrot.lane.b32.xlu0 %v320_v12, %s852_s10 }
 0x13e   : > { %328 = vrot.lane.b32.xlu1 %v320_v12, %s851_s28  ;;  %371 = vrot.lane.b32.xlu0 %v320_v12, %s853_s6  ;;  %s1095_s6 = scalar_lea.hbm %s1143_s4, %s642_s13 }
 0x142   : > { %383 = vrot.lane.b32.xlu1 %v319_v10, %s854_s7  ;;  %385 = vrot.lane.b32.xlu0 %v320_v12, %s854_s7  ;;  %s776_s7 = sshll.u32 %s858_s19, 4  ;;  %s777_s7 = int_to_ptr.vmem [resolvable:$false] %s776_s7 }
 0x143   : > { %p779_p10 = scmp.lt.s32.totalorder %s1097_s9, %s777_s7 }
 0x146   : > { %397 = vrot.lane.b32.xlu1 %v319_v10, %s855_s26  ;;  %399 = vrot.lane.b32.xlu0 %v320_v12, %s855_s26  ;;  %s778_s26 = scalar_lea.vmem %s777_s7, 1024 }
 0x14a   : > { %411 = vrot.lane.b32.xlu1 %v319_v10, %s856_s8  ;;  %413 = vrot.lane.b32.xlu0 %v320_v12, %s856_s8 }
 0x14e   : > { %425 = vrot.lane.b32.xlu1 %v319_v10, %s857_s25  ;;  %427 = vrot.lane.b32.xlu0 %v320_v12, %s857_s25  ;;  %v419_v10 = vld [vmem:[#allocation5 + $0x70] sm:$0xff] }
 0x152   : > { %441 = vperm.xlu1 %713, %v633_v13  }
 0x1a4   : > { %v342_v14 = vpop.permute.xlu1 %341  ;;  %v327_v15 = vpop.permute.xlu0 %326 }
 0x1a8   : > { %v356_v17 = vpop.permute.xlu1 %355  ;;  %v344_v18 = vpop.permute.xlu0 %343 }
 0x1a9   : > { %v346_v30 = vsel %vm345_vm1, %v342_v14, %v344_v18  ;;  %v347_v31 = vsel %vm345_vm1, %v344_v18, %v342_v14 }
 0x1aa   : > { %v351_v42 = vmul.f32 %v349_v28, %v347_v31  ;;  %v352_v43 = vmul.f32 %v350_v29, %v346_v30 }
 0x1ac   : > { %v370_v20 = vpop.permute.xlu1 %369  ;;  %v358_v21 = vpop.permute.xlu0 %357 }
 0x1ad   : > { %v360_v40 = vsel %vm359_vm3, %v356_v17, %v358_v21  ;;  %v361_v41 = vsel %vm359_vm3, %v358_v21, %v356_v17 }
 0x1ae   : > { %v365_v52 = vmul.f32 %v363_v38, %v361_v41  ;;  %v366_v53 = vmul.f32 %v364_v39, %v360_v40  ;;  %v521_v38 = vld [vmem:[%s1035_s29 + $0x8] sm:$0xff] }
 0x1af   : > { %523 = vst [vmem:[%s230_s21 + $0x8] sm:$0xff] %v521_v38 }
 0x1b0   : > { %v329_v26 = vpop.permute.xlu1 %328  ;;  %v372_v27 = vpop.permute.xlu0 %371 }
 0x1b1   : > { %v333_v32 = vsel %vm332_vm2, %v327_v15, %v329_v26  ;;  %v334_v33 = vsel %vm332_vm2, %v329_v26, %v327_v15  ;;  %v374_v50 = vsel %vm373_vm4, %v370_v20, %v372_v27  ;;  %v375_v51 = vsel %vm373_vm4, %v372_v27, %v370_v20  ;;  %v434_v26 = vld [vmem:[#allocation5 + $0x88] sm:$0xff] }
 0x1b2   : > { %v337_v36 = vmul.f32 %v335_v24, %v334_v33  ;;  %v338_v37 = vmul.f32 %v336_v25, %v333_v32  ;;  %v379_v62 = vmul.f32 %v377_v48, %v375_v51  ;;  %v380_v63 = vmul.f32 %v378_v49, %v374_v50  ;;  %v433_v25 = vld [vmem:[#allocation5 + $0x80] sm:$0xff] }
 0x1b4   : > { %v339_v44 = vadd.f32 %v337_v36, %v324_v35  ;;  %v340_v45 = vadd.f32 %v338_v37, %v325_v34  ;;  %v384_v46 = vpop.permute.xlu1 %383  ;;  %v386_v47 = vpop.permute.xlu0 %385  ;;  %v632_v36 = vld [vmem:[%s1140_s1 + $0x8] sm:$0xff]  ;;  %v520_v37 = vld [vmem:[%s1035_s29] sm:$0xff]  ;;  %s772_s29 = scalar_lea.vmem %s1097_s9, 512 }
 0x1b5   : > { %v388_v58 = vsel %vm387_vm5, %v384_v46, %v386_v47  ;;  %v389_v59 = vsel %vm387_vm5, %v386_v47, %v384_v46  ;;  %522 = vst [vmem:[%s230_s21] sm:$0xff] %v520_v37  ;;  %p773_p4 = scmp.ne.s32.totalorder %s1097_s9, %s772_s29  ;;  %p780_p13 = scmp.lt.s32.totalorder %s778_s26, %s772_s29 }
 0x1b6   : > { %v353_v54 = vadd.f32 %v351_v42, %v339_v44  ;;  %v354_v55 = vadd.f32 %v352_v43, %v340_v45  ;;  %v393_v8 = vmul.f32 %v391_v56, %v388_v58  ;;  %v394_v9 = vmul.f32 %v392_v57, %v389_v59 }
 0x1b7   : > { %p774_p6 = pnand %p773_p4, %p978_p12  ;;  %p781_p3 = por %p780_p13, %p779_p10 }
 0x1b8   : > { %v368_v60 = vadd.f32 %v366_v53, %v354_v55  ;;  %v367_v61 = vadd.f32 %v365_v52, %v353_v54  ;;  %v398_v0 = vpop.permute.xlu1 %397  ;;  %v400_v1 = vpop.permute.xlu0 %399 }
 0x1b9   : > { %v402_v4 = vsel %vm401_vm6, %v398_v0, %v400_v1  ;;  %v403_v5 = vsel %vm401_vm6, %v400_v1, %v398_v0  ;;  %p775_p8 = pneg %p774_p6 }
 0x1ba   : > { %v381_v6 = vadd.f32 %v379_v62, %v367_v61  ;;  %v382_v7 = vadd.f32 %v380_v63, %v368_v60  ;;  %v407_v14 = vmul.f32 %v405_v2, %v402_v4  ;;  %v408_v15 = vmul.f32 %v406_v3, %v403_v5 }
 0x1bb   : > { %p782_p7 = pnand %p781_p3, %p775_p8 }
 0x1bc   : > { %v395_v12 = vadd.f32 %v393_v8, %v381_v6  ;;  %v396_v13 = vadd.f32 %v394_v9, %v382_v7  ;;  %v412_v16 = vpop.permute.xlu1 %411  ;;  %v414_v17 = vpop.permute.xlu0 %413 }
 0x1bd   : > { %v416_v18 = vsel %vm415_vm7, %v412_v16, %v414_v17  ;;  %v417_v20 = vsel %vm415_vm7, %v414_v17, %v412_v16 }
 0x1be   : > { %v409_v21 = vadd.f32 %v407_v14, %v395_v12  ;;  %v421_v22 = vmul.f32 %v419_v10, %v416_v18  ;;  %v422_v23 = vmul.f32 %v420_v11, %v417_v20  ;;  %v410_v24 = vadd.f32 %v408_v15, %v396_v13 }
 0x1c0   : > { %v426_v27 = vpop.permute.xlu1 %425  ;;  %v428_v28 = vpop.permute.xlu0 %427  ;;  %v424_v32 = vadd.f32 %v422_v23, %v410_v24  ;;  %v423_v34 = vadd.f32 %v421_v22, %v409_v21 }
 0x1c1   : > { %v430_v29 = vsel %vm429_vm8, %v426_v27, %v428_v28  ;;  %v431_v30 = vsel %vm429_vm8, %v428_v28, %v426_v27 }
 0x1c2   : > { %v435_v31 = vmul.f32 %v433_v25, %v430_v29  ;;  %v436_v33 = vmul.f32 %v434_v26, %v431_v30 }
 0x1c4   : > { %v438_v35 = vadd.f32 %v436_v33, %v424_v32  ;;  %v437_v19 = vadd.f32 %v435_v31, %v423_v34 }
 0x1c6   : > { %447 = vmatprep.subr.mxu1 %v438_v35 }
 0x1c7   : > { %448 = vmatpush1.msra.mxu1 %v437_v19 }
 0x1c8   : > { %635 = vmatmul.mubr.msk.f32.vlgmr.msra.gmra.mrb[0].mxu1 %vm244_vm0, %v632_v36 }
 0x1d1   : > { %v442_v39 = vpop.permute.xlu1 %441 }
 0x29b   : > { %v513_v40 = vpop.f32.mrb[0].mxu1 }
 0x29c   : > { %v514_v41 = vadd.f32 %v513_v40, %v442_v39  ;;  %v515_v42 = vpop.f32.mrb[1].mxu1 }
 0x29d   : > { %v516_v43 = vadd.f32 %v515_v42, %v442_v39 }
 0x29e   : > { %v518_v44 = vmax.f32 %v514_v41, 0.0 }
 0x29f   : > { %v519_v45 = vmax.f32 %v516_v43, 0.0 }
 0x2a0   : > { %524 = vst [vmem:[%s230_s21 + $0x10] sm:$0xff] %v518_v44 }
 0x2a1   : > { %525 = vst [vmem:[%s230_s21 + $0x18] sm:$0xff] %v519_v45 }
 0x2a2   : > { %785 = shalt.err (!%p782_p7)
}
 0x2a3   : > { %s786_s11 = scalar_lea.hbm %s1095_s6, 512  ;;  %s790_s14 = scalar_lea.hbm %s1143_s4, 1024 }
 0x2a4   : > { %p787_p9 = scmp.ne.s32.totalorder %s1095_s6, %s786_s11  ;;  %p791_p5 = scmp.lt.u32.totalorder %s1095_s6, %s1143_s4 }
 0x2a5   : > { %p792_p11 = scmp.lt.u32.totalorder %s790_s14, %s786_s11  ;;  %p794_p4 = scmp.lt.u32.totalorder %s786_s11, %s1095_s6 }
 0x2a6   : > { %p788_p1 = pnand %p787_p9, %p978_p12 }
 0x2a7   : > { %p793_p2 = por %p792_p11, %p791_p5 }
 0x2a8   : > { %p789_p0 = pneg %p788_p1 }
 0x2a9   : > { %p795_p6 = por %p794_p4, %p793_p2 }
 0x2ab   : > { %p796_p8 = pnand %p795_p6, %p789_p0 }
 0x2ad   : > { %799 = shalt.err (!%p796_p8)
}
 0x2ae   : > { %649 = dma.vmem_to_hbm [thread:$0]  (%p978_p12), %s1097_s9, 512, %s1095_s6, %s527_s20  }
 0x2af PF: > { %s553_s12 = sand.u32 1, %s830_s15   ;;  %p1158_p10 = scmp.ne.s32.totalorder %s1148_s22, 0 }
 0x2b0   : > { %p1159_p13 = scmp.ge.s32.totalorder %s842_s18, 2  ;;  %s554_s21 = scalar_lea.sflag [#allocation4], %s553_s12 }
 0x2b2   : > { %p660_p3 = pnand %p1159_p13, %p1158_p10 }
 0x2b4   : > { %825 = dma.done.wait (!%p660_p3), %s554_s21, 512  }
 0x2b5   : > { %827 = vsyncadd (!%p660_p3), %s554_s21, 4294966784  ;;  %p18_p7 = scmp.ge.s32.totalorder %s940_s27, 4   ;;  %s1160_s15 = smov %s834_s16 }
 0x2b6   : > { %s1161_s16 = smov %s838_s17  ;;  %s1162_s17 = smov %s974_s24 }
 0x2b7   : > { %s1163_s18 = smov %s940_s27  ;;  %20 = sbr.rel (!%p18_p7) target bundleno = 6 (0x6), region = 95 }
 0x2be   :  { %559 = vsyncpa [#allocation3], 1 }
 0x2bf   :  { %561 = vsyncpa [#allocation3 + $0x1], 1 }
 0x2c0   :  { %562 = vsyncpa [#allocation6], 1 }
 0x2c1   :  { %563 = vsyncpa [#allocation4], 1 }
 0x2c2   :  { %565 = vsyncpa [#allocation4 + $0x1], 1 }

</bundles_post_ra>
